<compile_context>
chip_gen: v5e
topology: v5e:2x2
jax: 0.10.0
libtpu: 0.0.40
codegen_flags: <defaults>
</compile_context>

<pallas_src>
import math
import functools

import jax
import jax.numpy as jnp
from jax.experimental import pallas as pl
from jax.experimental.pallas import tpu as pltpu


def _round_up(x, m):
    return (x + m - 1) // m * m


# ----------------------------- QKV projection kernel -----------------------------

def _qkv_linear_kernel(x_ref, w_ref, b_ref, o_ref):
    # x: (TM, E) bf16, w: (E, 3E) bf16, b: (1, 3E) f32 -> o: (TM, 3E) bf16
    acc = jnp.dot(x_ref[...], w_ref[...], preferred_element_type=jnp.float32)
    o_ref[...] = (acc + b_ref[...]).astype(o_ref.dtype)


def qkv_linear(x, w, b, *, tm_cap=256):
    """(M, E) @ (E, 3E) + b, bf16 MXU inputs, f32 accumulate, bf16 output."""
    M, K = x.shape
    Kw, N = w.shape
    assert K == Kw
    x_bf = x.astype(jnp.bfloat16)
    w_bf = w.astype(jnp.bfloat16)
    b2 = b.reshape(1, N).astype(jnp.float32)

    Mp = _round_up(M, 8)
    TM = tm_cap if Mp >= tm_cap else Mp       # bounded M tile -> bounded VMEM
    Mp = _round_up(Mp, TM)
    if Mp != M:                               # skip pad when already aligned
        x_bf = jnp.pad(x_bf, ((0, Mp - M), (0, 0)))

    out = pl.pallas_call(
        _qkv_linear_kernel,
        out_shape=jax.ShapeDtypeStruct((Mp, N), jnp.bfloat16),
        grid=(Mp // TM,),
        in_specs=[
            pl.BlockSpec((TM, K), lambda i: (i, 0)),
            pl.BlockSpec((K, N), lambda i: (0, 0)),
            pl.BlockSpec((1, N), lambda i: (0, 0)),
        ],
        out_specs=pl.BlockSpec((TM, N), lambda i: (i, 0)),
        compiler_params=pltpu.CompilerParams(
            dimension_semantics=("parallel",)),
    )(x_bf, w_bf, b2)
    return out[:M]


# ------------------------------ fused attention kernel ---------------------------

def _attention_kernel(scale, mask_ref, q_ref, k_ref, v_ref, o_ref, s_ref):
    q = q_ref[0, 0, :, :]                     # (S, D) bf16
    k = k_ref[0, 0, :, :]                     # (S, D) bf16
    v = v_ref[0, 0, :, :]                     # (S, D) bf16

    # q @ k^T on the MXU, f32 accumulation, fused scale
    logits = jax.lax.dot_general(
        q, k, dimension_numbers=(((1,), (1,)), ((), ())),
        preferred_element_type=jnp.float32) * scale

    # masked_fill(mask == 0, -1000) — matches the reference semantics exactly
    mask_row = mask_ref[0, :, :]              # (1, S) f32
    logits = jnp.where(mask_row == 0.0, jnp.float32(-1000.0), logits)

    # numerically-stable softmax fused in-kernel
    m = jnp.max(logits, axis=-1, keepdims=True)
    p = jnp.exp(logits - m)
    scores = p / jnp.sum(p, axis=-1, keepdims=True)
    s_ref[0, 0, :, :] = scores

    # TODO(synk): training-mode Dropout on attention scores not reproduced (eval = identity).
    o_ref[0, 0, :, :] = jnp.dot(scores.astype(jnp.bfloat16), v,
                                preferred_element_type=jnp.float32)


def mha_attention(q, k, v, mask, *, scale):
    """q/k/v: (B, H, S, D); mask: (B, S). Returns (out f32 (B,H,S,D), scores f32 (B,H,S,S))."""
    B, H, S, D = q.shape
    q_bf = q.astype(jnp.bfloat16)
    k_bf = k.astype(jnp.bfloat16)
    v_bf = v.astype(jnp.bfloat16)
    mask3 = mask.reshape(B, 1, S).astype(jnp.float32)

    kernel = functools.partial(_attention_kernel, scale)
    out, scores = pl.pallas_call(
        kernel,
        out_shape=(jax.ShapeDtypeStruct((B, H, S, D), jnp.float32),
                   jax.ShapeDtypeStruct((B, H, S, S), jnp.float32)),
        grid=(B, H),
        in_specs=[
            pl.BlockSpec((1, 1, S), lambda b, h: (b, 0, 0)),
            pl.BlockSpec((1, 1, S, D), lambda b, h: (b, h, 0, 0)),
            pl.BlockSpec((1, 1, S, D), lambda b, h: (b, h, 0, 0)),
            pl.BlockSpec((1, 1, S, D), lambda b, h: (b, h, 0, 0)),
        ],
        out_specs=(pl.BlockSpec((1, 1, S, D), lambda b, h: (b, h, 0, 0)),
                   pl.BlockSpec((1, 1, S, S), lambda b, h: (b, h, 0, 0))),
        compiler_params=pltpu.CompilerParams(
            dimension_semantics=("parallel", "parallel")),
    )(mask3, q_bf, k_bf, v_bf)
    return out, scores


# ----------------------------------- module ---------------------------------------

class MultiHeadAttentionPallas:
    def __init__(self, embedding_size, num_heads, dropout=0.2, *, key):
        assert embedding_size % num_heads == 0
        self.num_heads = num_heads
        self.embedding_size = embedding_size
        self.head_size = embedding_size // num_heads
        self.dropout = dropout  # eval-mode: identity

        k_w, k_b = jax.random.split(key)
        bound = 1.0 / math.sqrt(embedding_size)
        # PyTorch nn.Linear stores weight as (out, in); pre-transpose once to (in, out)
        # so no per-forward transpose/reshape of the weights is needed.
        self.w_qkv = jax.random.uniform(
            k_w, (embedding_size, 3 * embedding_size), jnp.float32, -bound, bound)
        self.b_qkv = jax.random.uniform(
            k_b, (3 * embedding_size,), jnp.float32, -bound, bound)

    def __call__(self, input_sequence, attention_mask):
        # input_sequence: (B, S, E), attention_mask: (B, S) (0 = masked out)
        B, S, E = input_sequence.shape
        H, Dh = self.num_heads, self.head_size
        if attention_mask is None:
            attention_mask = jnp.ones((B, S), jnp.float32)

        x = input_sequence.reshape(B * S, E)
        qkv = qkv_linear(x, self.w_qkv, self.b_qkv)          # (B*S, 3E) bf16
        qkv = qkv.reshape(B, S, 3, H, Dh)
        q = jnp.transpose(qkv[:, :, 0], (0, 2, 1, 3))        # (B, H, S, Dh)
        k = jnp.transpose(qkv[:, :, 1], (0, 2, 1, 3))
        v = jnp.transpose(qkv[:, :, 2], (0, 2, 1, 3))

        out, scores = mha_attention(q, k, v, attention_mask,
                                    scale=1.0 / math.sqrt(Dh))
        out = jnp.transpose(out, (0, 2, 1, 3)).reshape(B, S, E)
        return out, scores


if __name__ == "__main__":
    key = jax.random.PRNGKey(0)
    k_params, k_x = jax.random.split(key)

    B, S, E, H = 2, 8, 32, 4
    model = MultiHeadAttentionPallas(embedding_size=E, num_heads=H, dropout=0.2,
                                     key=k_params)

    x = jax.random.normal(k_x, (B, S, E), jnp.float32)
    # valid-token mask: batch 0 fully valid, batch 1 has the first 5 tokens valid
    mask = (jnp.arange(S)[None, :] < jnp.array([[S], [5]])).astype(jnp.float32)

    fwd = jax.jit(lambda xx, mm: model(xx, mm))
    out, scores = jax.block_until_ready(fwd(x, mask))

    assert out.shape == (B, S, E), out.shape
    assert scores.shape == (B, H, S, S), scores.shape
    assert out.dtype == jnp.float32 and scores.dtype == jnp.float32
    assert bool(jnp.isfinite(out).all()) and bool(jnp.isfinite(scores).all())
    assert bool(jnp.allclose(scores.sum(-1), 1.0, atol=1e-3))
    print("KERNEL_OK")
</pallas_src>

<mosaic_0001>
module attributes {stable_mosaic.version = 11 : i64} {
  func.func @_qkv_linear_kernel(%arg0: i32, %arg1: memref<16x32xbf16, #tpu.memory_space<vmem>>, %arg2: memref<32x96xbf16, #tpu.memory_space<vmem>>, %arg3: memref<1x96xf32, #tpu.memory_space<vmem>>, %arg4: memref<16x96xbf16, #tpu.memory_space<vmem>>) attributes {dimension_semantics = [#tpu.dimension_semantics<parallel>], iteration_bounds = array<i64: 1>, scalar_prefetch = 0 : i64, scratch_operands = 0 : i64, tpu.core_type = #tpu.core_type<tc>, window_params = [{transform_indices = @transform_0, window_bounds = array<i64: 16, 32>}, {pipeline_mode = #tpu.pipeline_mode<synchronous>, transform_indices = @transform_1, window_bounds = array<i64: 32, 96>}, {pipeline_mode = #tpu.pipeline_mode<synchronous>, transform_indices = @transform_2, window_bounds = array<i64: 1, 96>}, {transform_indices = @transform_3, window_bounds = array<i64: 16, 96>}]} {
    %c0 = arith.constant 0 : index
    %c0_0 = arith.constant 0 : index
    %0 = vector.load %arg1[%c0, %c0_0] : memref<16x32xbf16, #tpu.memory_space<vmem>>, vector<16x32xbf16>
    %c0_1 = arith.constant 0 : index
    %c0_2 = arith.constant 0 : index
    %1 = vector.load %arg2[%c0_1, %c0_2] : memref<32x96xbf16, #tpu.memory_space<vmem>>, vector<32x96xbf16>
    %cst = arith.constant dense<0.000000e+00> : vector<16x96xf32>
    %2 = tpu.matmul %0, %1, %cst {dimension_numbers = #tpu.dot_dimension_numbers<[1], [0], [0], [1], [0, 0, 1, 1], [], []>} : vector<16x32xbf16>, vector<32x96xbf16>, vector<16x96xf32> -> vector<16x96xf32>
    %c0_3 = arith.constant 0 : index
    %c0_4 = arith.constant 0 : index
    %3 = vector.load %arg3[%c0_3, %c0_4] : memref<1x96xf32, #tpu.memory_space<vmem>>, vector<1x96xf32>
    %4 = vector.broadcast %3 : vector<1x96xf32> to vector<16x96xf32>
    %5 = arith.addf %2, %4 : vector<16x96xf32>
    %6 = arith.truncf %5 : vector<16x96xf32> to vector<16x96xbf16>
    %c0_5 = arith.constant 0 : index
    %c0_6 = arith.constant 0 : index
    %7 = vector.load %arg4[%c0_5, %c0_6] : memref<16x96xbf16, #tpu.memory_space<vmem>>, vector<16x96xbf16>
    tpu.vector_store %arg4[%c0_5, %c0_6], %6 {strides = array<i32>} : memref<16x96xbf16, #tpu.memory_space<vmem>>, vector<16x96xbf16>,
    return
  }
  func.func @transform_0(%arg0: i32) -> (i32, i32) {
    %c0_i32 = arith.constant 0 : i32
    %c0_i32_0 = arith.constant 0 : i32
    return %arg0, %c0_i32 : i32, i32
  }
  func.func @transform_1(%arg0: i32) -> (i32, i32) {
    %c0_i32 = arith.constant 0 : i32
    %c0_i32_0 = arith.constant 0 : i32
    %c0_i32_1 = arith.constant 0 : i32
    return %c0_i32, %c0_i32_0 : i32, i32
  }
  func.func @transform_2(%arg0: i32) -> (i32, i32) {
    %c0_i32 = arith.constant 0 : i32
    %c0_i32_0 = arith.constant 0 : i32
    %c0_i32_1 = arith.constant 0 : i32
    return %c0_i32, %c0_i32_0 : i32, i32
  }
  func.func @transform_3(%arg0: i32) -> (i32, i32) {
    %c0_i32 = arith.constant 0 : i32
    %c0_i32_0 = arith.constant 0 : i32
    return %arg0, %c0_i32 : i32, i32
  }
}

module attributes {stable_mosaic.version = 11 : i64} {
  func.func @_attention_kernel(%arg0: i32, %arg1: i32, %arg2: memref<1x1x8xf32, #tpu.memory_space<vmem>>, %arg3: memref<1x1x8x8xbf16, #tpu.memory_space<vmem>>, %arg4: memref<1x1x8x8xbf16, #tpu.memory_space<vmem>>, %arg5: memref<1x1x8x8xbf16, #tpu.memory_space<vmem>>, %arg6: memref<1x1x8x8xf32, #tpu.memory_space<vmem>>, %arg7: memref<1x1x8x8xf32, #tpu.memory_space<vmem>>) attributes {dimension_semantics = [#tpu.dimension_semantics<parallel>, #tpu.dimension_semantics<parallel>], iteration_bounds = array<i64: 2, 4>, scalar_prefetch = 0 : i64, scratch_operands = 0 : i64, tpu.core_type = #tpu.core_type<tc>, window_params = [{transform_indices = @transform_0, window_bounds = array<i64: 1, 1, 8>}, {transform_indices = @transform_1, window_bounds = array<i64: 1, 1, 8, 8>}, {transform_indices = @transform_2, window_bounds = array<i64: 1, 1, 8, 8>}, {transform_indices = @transform_3, window_bounds = array<i64: 1, 1, 8, 8>}, {transform_indices = @transform_4, window_bounds = array<i64: 1, 1, 8, 8>}, {transform_indices = @transform_5, window_bounds = array<i64: 1, 1, 8, 8>}]} {
    %c0 = arith.constant 0 : index
    %c0_0 = arith.constant 0 : index
    %c0_1 = arith.constant 0 : index
    %c0_2 = arith.constant 0 : index
    %0 = vector.load %arg3[%c0, %c0_0, %c0_1, %c0_2] : memref<1x1x8x8xbf16, #tpu.memory_space<vmem>>, vector<1x1x8x8xbf16>
    %1 = vector.shape_cast %0 : vector<1x1x8x8xbf16> to vector<8x8xbf16>
    %c0_3 = arith.constant 0 : index
    %c0_4 = arith.constant 0 : index
    %c0_5 = arith.constant 0 : index
    %c0_6 = arith.constant 0 : index
    %2 = vector.load %arg4[%c0_3, %c0_4, %c0_5, %c0_6] : memref<1x1x8x8xbf16, #tpu.memory_space<vmem>>, vector<1x1x8x8xbf16>
    %3 = vector.shape_cast %2 : vector<1x1x8x8xbf16> to vector<8x8xbf16>
    %c0_7 = arith.constant 0 : index
    %c0_8 = arith.constant 0 : index
    %c0_9 = arith.constant 0 : index
    %c0_10 = arith.constant 0 : index
    %4 = vector.load %arg5[%c0_7, %c0_8, %c0_9, %c0_10] : memref<1x1x8x8xbf16, #tpu.memory_space<vmem>>, vector<1x1x8x8xbf16>
    %5 = vector.shape_cast %4 : vector<1x1x8x8xbf16> to vector<8x8xbf16>
    %cst = arith.constant dense<0.000000e+00> : vector<8x8xf32>
    %6 = tpu.matmul %1, %3, %cst {dimension_numbers = #tpu.dot_dimension_numbers<[1], [1], [0], [0], [0, 0, 1, 0], [], []>} : vector<8x8xbf16>, vector<8x8xbf16>, vector<8x8xf32> -> vector<8x8xf32>
    %cst_11 = arith.constant 0.353553385 : f32
    %7 = vector.broadcast %cst_11 : f32 to vector<8x8xf32>
    %8 = arith.mulf %6, %7 : vector<8x8xf32>
    %c0_12 = arith.constant 0 : index
    %c0_13 = arith.constant 0 : index
    %c0_14 = arith.constant 0 : index
    %9 = vector.load %arg2[%c0_12, %c0_13, %c0_14] : memref<1x1x8xf32, #tpu.memory_space<vmem>>, vector<1x1x8xf32>
    %10 = vector.shape_cast %9 : vector<1x1x8xf32> to vector<1x8xf32>
    %cst_15 = arith.constant 0.000000e+00 : f32
    %11 = vector.broadcast %cst_15 : f32 to vector<1x8xf32>
    %12 = arith.cmpf oeq, %10, %11 : vector<1x8xf32>
    %cst_16 = arith.constant -1.000000e+03 : f32
    %13 = vector.shape_cast %12 : vector<1x8xi1> to vector<1x8xi1>
    %14 = vector.broadcast %13 : vector<1x8xi1> to vector<8x8xi1>
    %15 = vector.broadcast %cst_16 : f32 to vector<8x8xf32>
    %16 = arith.select %14, %15, %8 : vector<8x8xi1>, vector<8x8xf32>
    %cst_17 = arith.constant dense<0xFF800000> : vector<8xf32>
    %17 = vector.multi_reduction <maximumf>, %16, %cst_17 [1] : vector<8x8xf32> to vector<8xf32>
    %18 = vector.shape_cast %17 : vector<8xf32> to vector<8x1xf32>
    %19 = vector.broadcast %18 : vector<8x1xf32> to vector<8x8xf32>
    %20 = arith.subf %16, %19 : vector<8x8xf32>
    %21 = math.exp %20 : vector<8x8xf32>
    %cst_18 = arith.constant dense<0.000000e+00> : vector<8xf32>
    %22 = vector.multi_reduction <add>, %21, %cst_18 [1] : vector<8x8xf32> to vector<8xf32>
    %23 = vector.shape_cast %22 : vector<8xf32> to vector<8x1xf32>
    %24 = vector.broadcast %23 : vector<8x1xf32> to vector<8x8xf32>
    %25 = arith.divf %21, %24 : vector<8x8xf32>
    %c0_19 = arith.constant 0 : index
    %c0_20 = arith.constant 0 : index
    %c0_21 = arith.constant 0 : index
    %c0_22 = arith.constant 0 : index
    %26 = vector.load %arg7[%c0_19, %c0_20, %c0_21, %c0_22] : memref<1x1x8x8xf32, #tpu.memory_space<vmem>>, vector<1x1x8x8xf32>
    %27 = vector.shape_cast %26 : vector<1x1x8x8xf32> to vector<8x8xf32>
    %28 = vector.shape_cast %25 : vector<8x8xf32> to vector<1x1x8x8xf32>
    tpu.vector_store %arg7[%c0_19, %c0_20, %c0_21, %c0_22], %28 {strides = array<i32>} : memref<1x1x8x8xf32, #tpu.memory_space<vmem>>, vector<1x1x8x8xf32>,
    %29 = arith.truncf %25 : vector<8x8xf32> to vector<8x8xbf16>
    %cst_23 = arith.constant dense<0.000000e+00> : vector<8x8xf32>
    %30 = tpu.matmul %29, %5, %cst_23 {dimension_numbers = #tpu.dot_dimension_numbers<[1], [0], [0], [1], [0, 0, 1, 1], [], []>} : vector<8x8xbf16>, vector<8x8xbf16>, vector<8x8xf32> -> vector<8x8xf32>
    %c0_24 = arith.constant 0 : index
    %c0_25 = arith.constant 0 : index
    %c0_26 = arith.constant 0 : index
    %c0_27 = arith.constant 0 : index
    %31 = vector.load %arg6[%c0_24, %c0_25, %c0_26, %c0_27] : memref<1x1x8x8xf32, #tpu.memory_space<vmem>>, vector<1x1x8x8xf32>
    %32 = vector.shape_cast %31 : vector<1x1x8x8xf32> to vector<8x8xf32>
    %33 = vector.shape_cast %30 : vector<8x8xf32> to vector<1x1x8x8xf32>
    tpu.vector_store %arg6[%c0_24, %c0_25, %c0_26, %c0_27], %33 {strides = array<i32>} : memref<1x1x8x8xf32, #tpu.memory_space<vmem>>, vector<1x1x8x8xf32>,
    return
  }
  func.func @transform_0(%arg0: i32, %arg1: i32) -> (i32, i32, i32) {
    %c0_i32 = arith.constant 0 : i32
    %c0_i32_0 = arith.constant 0 : i32
    %c0_i32_1 = arith.constant 0 : i32
    return %arg0, %c0_i32, %c0_i32_0 : i32, i32, i32
  }
  func.func @transform_1(%arg0: i32, %arg1: i32) -> (i32, i32, i32, i32) {
    %c0_i32 = arith.constant 0 : i32
    %c0_i32_0 = arith.constant 0 : i32
    %c0_i32_1 = arith.constant 0 : i32
    return %arg0, %arg1, %c0_i32, %c0_i32_0 : i32, i32, i32, i32
  }
  func.func @transform_2(%arg0: i32, %arg1: i32) -> (i32, i32, i32, i32) {
    %c0_i32 = arith.constant 0 : i32
    %c0_i32_0 = arith.constant 0 : i32
    %c0_i32_1 = arith.constant 0 : i32
    return %arg0, %arg1, %c0_i32, %c0_i32_0 : i32, i32, i32, i32
  }
  func.func @transform_3(%arg0: i32, %arg1: i32) -> (i32, i32, i32, i32) {
    %c0_i32 = arith.constant 0 : i32
    %c0_i32_0 = arith.constant 0 : i32
    %c0_i32_1 = arith.constant 0 : i32
    return %arg0, %arg1, %c0_i32, %c0_i32_0 : i32, i32, i32, i32
  }
  func.func @transform_4(%arg0: i32, %arg1: i32) -> (i32, i32, i32, i32) {
    %c0_i32 = arith.constant 0 : i32
    %c0_i32_0 = arith.constant 0 : i32
    %c0_i32_1 = arith.constant 0 : i32
    return %arg0, %arg1, %c0_i32, %c0_i32_0 : i32, i32, i32, i32
  }
  func.func @transform_5(%arg0: i32, %arg1: i32) -> (i32, i32, i32, i32) {
    %c0_i32 = arith.constant 0 : i32
    %c0_i32_0 = arith.constant 0 : i32
    %c0_i32_1 = arith.constant 0 : i32
    return %arg0, %arg1, %c0_i32, %c0_i32_0 : i32, i32, i32, i32
  }
}

</mosaic_0001>

<bundles_post_ra>
// kernel: _lambda_.2
= control target key start
LH: loop header
LB: loop body
LE: loop exit
PB: predicated region body
PF: predicated region fallthrough
CT: control target
= control target key end

     0   :  { %vm42_vm0 = vcmask 261120   ;;  %vm62_vm1 = vcmask 781312   ;;  %s124_s1 = inlined_call_operand.vmem [shape: bf16[32,96], index: 1, kind: input, shape index: {}]   ;;  %s125_s2 = inlined_call_operand.vmem [shape: f32[1,96], index: 2, kind: input, shape index: {}]   ;;  %s126_s0 = inlined_call_operand.vmem [shape: bf16[16,32], index: 0, kind: input, shape index: {}]   ;;  %s127_s3 = inlined_call_operand.vmem [shape: bf16[16,96], index: 3, kind: output, shape index: {}]  }
   0x1   :  { %v84_v0 = vld [vmem:[%s124_s1 + $0x8] sm:$0xff]  ;;  %v83_v1 = vld [vmem:[%s124_s1] sm:$0xff] }
   0x2   :  { %52 = vmatpush.bf16.msra.mxu0 %v84_v0  ;;  %v82_v2 = vld [vmem:[%s126_s0] sm:$0xff] }
   0x3   :  { %v85_v3 = vld [vmem:[%s125_s2] ss:$0 sm:$0xff] }
   0x6   :  { %53 = vmatpush.bf16.msra.mxu0 %v83_v1 }
   0x9   :  { %81 = vmatmul.msk.bf16.vlgmr.msra.gmra.mxu0 %vm42_vm0, %v82_v2 }
  0x86   :  { %v55_v4 = vpop.f32.mrf.mxu0 }
  0x87   :  { %v56_v5 = vadd.f32 %v85_v3, %v55_v4 }
  0x89   :  { %v60_v6 = vpack.c.bf16 %v56_v5, %v56_v5 }
  0x8b   :  { %63 = vst.msk [vmem:[%s127_s3] sm:$0xf] %vm62_vm1, %v60_v6 }
  0x8e   :  { %v57_v7 = vpop.f32.mrf.mxu0 }
  0x8f   :  { %v58_v8 = vadd.f32 %v85_v3, %v57_v7 }
  0x91   :  { %v61_v9 = vpack.c.bf16 %v58_v8, %v58_v8 }
  0x93   :  { %64 = vst.msk [vmem:[%s127_s3 + $0x4] sm:$0xf] %vm62_vm1, %v61_v9 }

// kernel: _lambda_.3
= control target key start
LH: loop header
LB: loop body
LE: loop exit
PB: predicated region body
PF: predicated region fallthrough
CT: control target
= control target key end

     0   :  { %s985_s0 = inlined_call_operand.vmem [shape: f32[2,1,8], index: 0, kind: input, shape index: {}]   ;;  %s986_s1 = inlined_call_operand.vmem [shape: bf16[2,4,8,8], index: 1, kind: input, shape index: {}]   ;;  %s987_s2 = inlined_call_operand.vmem [shape: bf16[2,4,8,8], index: 2, kind: input, shape index: {}]   ;;  %s988_s3 = inlined_call_operand.vmem [shape: bf16[2,4,8,8], index: 3, kind: input, shape index: {}]   ;;  %s989_s4 = inlined_call_operand.vmem [shape: f32[2,4,8,8], index: 4, kind: output, shape index: {0}]   ;;  %s990_s5 = inlined_call_operand.hbm [shape: f32[2,4,8,8], index: 5, kind: output, shape index: {1}]  }
   0x1   :  { %991 = sst [smem:[#allocation5_spill]] %s985_s0 }
   0x2   :  { %992 = sst [smem:[#allocation6_spill]] %s986_s1 }
   0x3   :  { %993 = sst [smem:[#allocation7_spill]] %s987_s2 }
   0x4   :  { %11 = vsyncpa [#allocation3], 0 }
   0x5   :  { %13 = vsyncpa [#allocation3 + $0x1], 0  ;;  %s835_s18 = smov 0   ;;  %s837_s19 = smov 0  }
   0x6   :  { %s839_s20 = smov 0   ;;  %s841_s21 = smov 0  }
   0x7   :  { %s843_s22 = smov 0   ;;  %s845_s23 = smov 0  }
   0x8   :  { %s847_s24 = smov 0   ;;  %s849_s25 = smov 0  }
   0x9 LB: > { %s611_s26 = sadd.s32 4294967295, %s802_s25   ;;  %s612_s27 = sadd.s32 4294967294, %s802_s25   ;;  %s802_s25 = sphi %s849_s25, %s19_s25   ;;  %s798_s24 = sphi %s847_s24, %s1005_s24   ;;  %s794_s23 = sphi %s845_s23, %s1004_s23   ;;  %s790_s22 = sphi %s843_s22, %s1003_s22   ;;  %s786_s21 = sphi %s841_s21, %s1002_s21   ;;  %s782_s20 = sphi %s839_s20, %s1001_s20   ;;  %s778_s19 = sphi %s837_s19, %s1000_s19   ;;  %s774_s18 = sphi %s835_s18, %s999_s18  }
   0xa   : > { %s28_s28 = sadd.s32 1, %s794_s23  ;;  %s31_s29 = sadd.s32 1, %s798_s24 }
   0xb   : > { %p29_p0 = scmp.ge.s32.totalorder %s28_s28, 4  ;;  %p188_p1 = scmp.ne.s32.totalorder %s782_s20, %s778_s19 }
   0xc   : > { %p189_p2 = scmp.eq.s32.totalorder %s611_s26, 7  ;;  %p194_p5 = scmp.ne.s32.totalorder %s778_s19, %s774_s18 }
   0xd   : > { %s1007_s28 = smov (%p29_p0, %s28_s28), 0  ;;  %s1009_s29 = smov (!%p29_p0, %s31_s29), %s798_s24 }
   0xe   : > { %s174_s30 = ssub.s32 %s794_s23, %s1007_s28  ;;  %p886_p3 = por %p189_p2, %p188_p1 }
   0xf   : > { %p33_p4 = scmp.ge.s32.totalorder %s1009_s29, 2  ;;  %p195_p6 = scmp.eq.s32.totalorder %s612_s27, 7 }
  0x10   : > { %p615_p7 = scmp.ge.s32.totalorder %s802_s25, 1  ;;  %p252_p9 = scmp.lt.s32.totalorder %s802_s25, 9 }
  0x11   : > { %s1011_s29 = smov (%p33_p4, %s1009_s29), 0  ;;  %p895_p8 = por %p195_p6, %p194_p5 }
  0x12   : > { %s173_s8 = ssub.s32 %s798_s24, %s1011_s29  ;;  %s178_s9 = sadd.s32 1, %s782_s20 }
  0x13   : > { %s175_s10 = sor.u32 %s174_s30, %s173_s8  ;;  %p253_p10 = pnand %p615_p7, %p252_p9 }
  0x14   : > { %p176_p11 = scmp.eq.s32.totalorder %s175_s10, 0  ;;  %p310_p12 = scmp.lt.s32.totalorder (!%p253_p10), %s790_s22, 1 }
  0x15   : > { %256 = sbr.rel (%p253_p10) target bundleno = 570 (0x23a), region = 36  ;;  %p315_p13 = scmp.lt.s32.totalorder (!%p253_p10), %s786_s21, 3 }
  0x16   : > { %s904_s11 = scalar_select %p176_p11, %s782_s20, %s178_s9  }
  0x17   : > { %s996_s2 = sld [smem:[#allocation7_spill]] (!%p253_p10)  ;;  %s628_s8 = sshll.u32 (!%p253_p10), %s790_s22, 2 }
  0x18   : > { %s997_s1 = sld [smem:[#allocation6_spill]] (!%p253_p10) }
  0x19   : > { %s998_s0 = sld [smem:[#allocation5_spill]] (!%p253_p10) }
  0x1a   : > { %s311_s12 = scalar_select %p310_p12, %s790_s22, 1  ;;  %vm349_vm0 = vcmask 64512   ;;  %v804_v4 = vmov 0   ;;  %vm405_vm3 = vcmask 1043456  }
  0x1b   : > { %s316_s13 = scalar_select %p315_p13, %s786_s21, 3 }
  0x1c   : > { %s617_s14 = sshll.u32 %s311_s12, 2 }
  0x1d   : > { %s910_s15 = sadd.s32 %s617_s14, %s316_s13 }
  0x1e   : > { %s913_s16 = sshll.u32 %s910_s15, 2 }
  0x1f   : > { %s328_s27 = scalar_lea.vmem %s996_s2, %s913_s16  ;;  %s320_s9 = scalar_lea.vmem %s997_s1, %s913_s16 }
  0x20   : > { %v347_v0 = vld [vmem:[%s328_s27] sm:$0xf]  ;;  %s312_s14 = scalar_lea.vmem %s998_s0, %s311_s12  ;;  %s336_s26 = scalar_lea.vmem %s988_s3, %s913_s16 }
  0x21   : > { %v354_v1 = vsel %vm349_vm0, %v347_v0, 0  ;;  %v346_v2 = vld [vmem:[%s320_s9] sm:$0xf]  ;;  %s307_s27 = sand.u32 1, %s778_s19   ;;  %s445_s9 = sadd.s32 %s786_s21, %s628_s8 }
  0x22   : > { %363 = vmatpush.bf16.xpose.msra.mxu0 %v354_v1  ;;  %v370_v3 = vld [vmem:[%s312_s14] sm:$0x1]  ;;  %s616_s30 = sshll.u32 %s307_s27, 3  ;;  %s629_s10 = sshll.u32 %s445_s9, 3 }
  0x23   : > { %vm371_vm1 = vcmp.eq.f32.partialorder %v370_v3, 0.0  ;;  %v348_v17 = vld [vmem:[%s336_s26] sm:$0xf]  ;;  %s309_s16 = scalar_lea.vmem [#allocation2], %s616_s30  ;;  %s447_s12 = scalar_lea.hbm %s990_s5, %s629_s10 }
  0x24   : > { %v372_v5 = vsel %vm371_vm1, 1, %v804_v4  ;;  %v407_v18 = vsel %vm405_vm3, %v348_v17, 0  ;;  %s449_s17 = sshll.u32 %s309_s16, 4  ;;  %s451_s26 = sshll.u32 %s447_s12, 4  ;;  %s450_s17 = int_to_ptr.vmem [resolvable:$true] %s449_s17  ;;  %s452_s26 = int_to_ptr.hbm [resolvable:$true] %s451_s26 }
  0x25   : > { %v373_v6 = vperm.slane %v372_v5, 0  ;;  %416 = vmatpush.bf16.msra.mxu1 %v407_v18  ;;  %s432_s0 = scalar_lea.sflag [#allocation3], %s307_s27  ;;  %s722_s1 = sshra.s32 %s452_s26, 4  ;;  %s723_s1 = int_to_ptr.hbm [resolvable:$true] %s722_s1 }
  0x26   : > { %s724_s30 = scalar_lea.hbm %s723_s1, 8  ;;  %s728_s21 = scalar_lea.hbm %s990_s5, 64 }
  0x27   : > { %vm374_vm2 = vcmp.eq.s32.totalorder %v373_v6, 1  ;;  %p725_p0 = scmp.ne.s32.totalorder %s723_s1, %s724_s30  ;;  %p729_p4 = scmp.lt.s32.totalorder %s723_s1, %s990_s5 }
  0x28   : > { %p730_p5 = scmp.lt.s32.totalorder %s728_s21, %s724_s30 }
  0x29   : > { %625 = vmatmul.msk.bf16.vlgmr.msra.gmra.mxu0 %vm349_vm0, %v346_v2  ;;  %p726_p1 = pnand %p725_p0, %p886_p3 }
  0x2a   : > { %p731_p6 = por %p730_p5, %p729_p4 }
  0x2b   : > { %p727_p2 = pneg %p726_p1 }
  0x2d   : > { %p732_p7 = pnand %p731_p6, %p727_p2 }
  0xa6   : > { %v365_v7 = vpop.f32.mrf.mxu0 }
  0xa7   : > { %v369_v8 = vmul.f32 0.35355338, %v365_v7 }
  0xa9   : > { %v375_v9 = vsel %vm374_vm2, -1000.0, %v369_v8 }
  0xaa   : > { %v376_v10 = vsel %vm349_vm0, %v375_v9, -inf }
  0xab   : > { %377 = vmax.xlane.f32.xlu0 %v376_v10 }
  0xae   : > { %v367_v11 = vpop.f32.mrf.mxu0 }
 0x11e   : > { %v378_v12 = vpop.xlane.xlu0 %377 }
 0x11f   : > { %v379_v13 = vsub.f32 %v375_v9, %v378_v12 }
 0x121   : > { %v380_v14 = vmul.f32 1.442695, %v379_v13 }
 0x123   : > { %704 = vpow2.f32 %v380_v14 }
 0x129   : > { %v705_v15 = vpop.eup %704 }
 0x12a   : > { %v382_v16 = vsel %vm349_vm0, %v705_v15, 0.0 }
 0x12b   : > { %383 = vadd.xlane.f32.xlu0 %v382_v16 }
 0x19e   : > { %v384_v19 = vpop.xlane.xlu0 %383 }
 0x19f   : > { %706 = vrcp.f32 %v384_v19  ;;  %v396_v23 = vand.u32 2147483648, %v384_v19  ;;  %v394_v25 = vand.u32 2147483647, %v384_v19  ;;  %vm390_vm5 = vweird.f32 %v384_v19 }
 0x1a1   : > { %v397_v27 = vor.u32 1.1754944e-38, %v396_v23  ;;  %vm395_vm7 = vcmp.eq.f32.partialorder %v394_v25, 8.507059e+37 }
 0x1a5   : > { %v707_v20 = vpop.eup %706 }
 0x1a6   : > { %v386_v21 = vmul.f32 %v707_v20, %v384_v19  ;;  %vm391_vm4 = vweird.f32 %v707_v20 }
 0x1a7   : > { %vm392_vm6 = vmor %vm390_vm5, %vm391_vm4 }
 0x1a8   : > { %v387_v22 = vsub.f32 1.0, %v386_v21 }
 0x1aa   : > { %v388_v24 = vmul.f32 %v707_v20, %v387_v22 }
 0x1ac   : > { %v389_v26 = vadd.f32 %v707_v20, %v388_v24 }
 0x1ae   : > { %v393_v28 = vsel %vm392_vm6, %v707_v20, %v389_v26 }
 0x1af   : > { %v398_v29 = vsel %vm395_vm7, %v397_v27, %v393_v28 }
 0x1b0   : > { %v399_v30 = vmul.f32 %v705_v15, %v398_v29 }
 0x1b2   : > { %v401_v31 = vpack.c.bf16 %v399_v30, %v399_v30  ;;  %400 = vst.msk [vmem:[%s309_s16] sm:$0xff] %vm349_vm0, %v399_v30 }
 0x1b4   : > { %626 = vmatmul.msk.bf16.vlgmr.msra.gmra.mxu1 %vm349_vm0, %v401_v31 }
 0x1b5   : > { %735 = shalt.err (!%p732_p7)
}
 0x1b6   : > { %632 = dma.vmem_to_hbm [thread:$0]  (%p886_p3), %s450_s17, 128, %s452_s26, %s432_s0  }
 0x1b7   : > { %s624_s27 = sshll.u32 %s910_s15, 3 }
 0x1b8   : > { %s344_s13 = scalar_lea.vmem %s989_s4, %s624_s27 }
 0x231   : > { %v418_v32 = vpop.f32.mrf.mxu1 }
 0x232   : > { %422 = vst.msk [vmem:[%s344_s13] sm:$0xff] %vm349_vm0, %v418_v32 }
 0x239   : > { %v420_v33 = vpop.f32.mrf.mxu1 }
 0x23a PF: > { %p638_p9 = scmp.ge.s32.totalorder %s802_s25, 2  ;;  %s474_s1 = sand.u32 1, %s774_s18  }
 0x23b   : > { %s475_s2 = scalar_lea.sflag [#allocation3], %s474_s1 }
 0x23c   : > { %p635_p10 = pnand %p638_p9, %p895_p8 }
 0x23e   : > { %p636_p11 = pneg %p635_p10 }
 0x240   : > { %769 = dma.done.wait (%p636_p11), %s475_s2, 128  }
 0x241   : > { %771 = vsyncadd (%p636_p11), %s475_s2, 4294967168  ;;  %s19_s25 = sadd.s32 1, %s802_s25   ;;  %s999_s18 = smov %s778_s19 }
 0x242   : > { %p16_p3 = scmp.ge.s32.totalorder %s19_s25, 10   ;;  %s1000_s19 = smov %s782_s20 }
 0x243   : > { %s1001_s20 = smov %s904_s11  ;;  %s1002_s21 = smov %s794_s23 }
 0x244   : > { %s1003_s22 = smov %s798_s24  ;;  %s1004_s23 = smov %s1007_s28 }
 0x245   : > { %s1005_s24 = smov %s1011_s29  ;;  %18 = sbr.rel (!%p16_p3) target bundleno = 9 (0x9), region = 92 }
 0x24a   :  { %481 = vsyncpa [#allocation3], 1 }
 0x24b   :  { %483 = vsyncpa [#allocation3 + $0x1], 1 }

</bundles_post_ra>
